<compile_context>
chip_gen: v7x
topology: tpu7x:2x2x1
jax: 0.10.0
libtpu: 0.0.40
codegen_flags: <defaults>
</compile_context>

<pallas_src>
import functools

import jax
import jax.numpy as jnp
import numpy as np
from jax.experimental import pallas as pl
from jax.experimental.pallas import tpu as pltpu

LANES = 128
TILE_ROWS_MAX = 1024   # up to (1024, 128) f32 = 512 KiB per input per step
NUM_CORES = 2          # leading "parallel" grid axis for v7x megacore


def _dice_bce_kernel(x_ref, t_ref, o_ref, *, n_valid, tile_rows, blocks_per_core):
    # o_ref: (4, 8, LANES) per-core accumulator, resident across grid axis 1:
    #   slab 0: sum(p * t)   (intersection)
    #   slab 1: sum(p)
    #   slab 2: sum(t)
    #   slab 3: sum(per-element BCE)
    @pl.when(pl.program_id(1) == 0)
    def _():
        o_ref[...] = jnp.zeros_like(o_ref)

    x = x_ref[...].astype(jnp.float32)
    t = t_ref[...].astype(jnp.float32)

    # Validity mask from the global flat element index. Covers both the
    # wrapper's 1024-element tail pad and any partial boundary block /
    # duplicated (clamped) block on the second core.
    block_idx = pl.program_id(0) * blocks_per_core + pl.program_id(1)
    row0 = block_idx * tile_rows
    row_ids = jax.lax.broadcasted_iota(jnp.int32, x.shape, 0) + row0
    lane_ids = jax.lax.broadcasted_iota(jnp.int32, x.shape, 1)
    valid = (row_ids * LANES + lane_ids) < n_valid

    # Stable sigmoid + BCE-with-logits. Mathematically identical to
    # binary_cross_entropy(sigmoid(x), t) with torch's -100 log clamp
    # (clamping log at -100 == clamping each softplus term at 100).
    e = jnp.exp(-jnp.abs(x))                       # EUP exp
    inv = 1.0 / (1.0 + e)                          # EUP reciprocal
    p = jnp.where(x >= 0.0, inv, e * inv)          # sigmoid(x)
    softplus_pos = jnp.maximum(x, 0.0) + jnp.log(1.0 + e)   # -log(1 - p)
    softplus_neg = softplus_pos - x                          # -log(p)
    bce = (t * jnp.minimum(softplus_neg, 100.0)
           + (1.0 - t) * jnp.minimum(softplus_pos, 100.0))

    zero = jnp.zeros_like(x)

    def fold(v):
        # mask invalid elements, then (tile_rows, LANES) -> (8, LANES)
        # using only vreg-wise adds (the reshape splits the sublane axis
        # on vreg boundaries, so no XLU relayout).
        v = jnp.where(valid, v, zero)
        return v.reshape(tile_rows // 8, 8, LANES).sum(axis=0)

    o_ref[0, :, :] = o_ref[0, :, :] + fold(p * t)
    o_ref[1, :, :] = o_ref[1, :, :] + fold(p)
    o_ref[2, :, :] = o_ref[2, :, :] + fold(t)
    o_ref[3, :, :] = o_ref[3, :, :] + fold(bce)


@functools.partial(jax.jit, static_argnames=("smooth",))
def dice_bce_loss(inputs, targets, smooth=1.0):
    n = inputs.size
    x = inputs.reshape(-1)   # keep original dtype; cast happens in-kernel
    t = targets.reshape(-1)

    # Pad only when needed so the flat length is a multiple of 8*128
    # (keeps rows a multiple of 8; the reshape itself is free).
    chunk = 8 * LANES
    padded_n = ((n + chunk - 1) // chunk) * chunk
    if padded_n != n:
        x = jnp.pad(x, (0, padded_n - n))
        t = jnp.pad(t, (0, padded_n - n))

    rows = padded_n // LANES
    x2 = x.reshape(rows, LANES)
    t2 = t.reshape(rows, LANES)

    tile_rows = min(TILE_ROWS_MAX, rows)          # multiple of 8 by construction
    row_blocks = pl.cdiv(rows, tile_rows)
    num_cores = NUM_CORES if row_blocks >= NUM_CORES else 1
    blocks_per_core = pl.cdiv(row_blocks, num_cores)

    kernel = functools.partial(
        _dice_bce_kernel,
        n_valid=n, tile_rows=tile_rows, blocks_per_core=blocks_per_core)

    def in_map(c, i):
        # Clamp so a core with fewer real blocks never maps past the array;
        # the in-kernel mask zeroes the duplicated contribution.
        return (jnp.minimum(c * blocks_per_core + i, row_blocks - 1), 0)

    in_spec = pl.BlockSpec((tile_rows, LANES), in_map)

    bytes_in = (x2.size * x2.dtype.itemsize) + (t2.size * t2.dtype.itemsize)
    out = pl.pallas_call(
        kernel,
        out_shape=jax.ShapeDtypeStruct((num_cores, 4, 8, LANES), jnp.float32),
        grid_spec=pltpu.PrefetchScalarGridSpec(
            num_scalar_prefetch=0,
            grid=(num_cores, blocks_per_core),
            in_specs=[in_spec, in_spec],
            out_specs=pl.BlockSpec((None, 4, 8, LANES),
                                   lambda c, i: (c, 0, 0, 0)),
        ),
        compiler_params=pltpu.CompilerParams(
            dimension_semantics=("parallel", "arbitrary")),
        cost_estimate=pl.CostEstimate(
            flops=20 * padded_n,
            transcendentals=3 * padded_n,
            bytes_accessed=int(bytes_in + num_cores * 4 * 8 * LANES * 4),
        ),
    )(x2, t2)

    # Final glue: reduce the (num_cores, 4, 8, 128) partial sums to 4 scalars.
    sums = jnp.sum(out, axis=(0, 2, 3))
    intersection, p_sum, t_sum, bce_sum = sums[0], sums[1], sums[2], sums[3]

    dice_loss = 1.0 - (2.0 * intersection + smooth) / (p_sum + t_sum + smooth)
    bce_mean = bce_sum / n
    return bce_mean + dice_loss


def _reference(inputs, targets, smooth=1.0):
    p = jax.nn.sigmoid(inputs.reshape(-1).astype(jnp.float32))
    t = targets.reshape(-1).astype(jnp.float32)
    inter = jnp.sum(p * t)
    dice = 1.0 - (2.0 * inter + smooth) / (jnp.sum(p) + jnp.sum(t) + smooth)
    bce = jnp.mean(
        -(t * jnp.maximum(jnp.log(p), -100.0)
          + (1.0 - t) * jnp.maximum(jnp.log(1.0 - p), -100.0))
    )
    return bce + dice


if __name__ == "__main__":
    key = jax.random.PRNGKey(0)
    k1, k2, k3, k4 = jax.random.split(key, 4)

    # Primary small case: NCHW segmentation logits / binary masks.
    inputs = jax.random.normal(k1, (2, 4, 16, 16), dtype=jnp.float32)
    targets = (jax.random.uniform(k2, (2, 4, 16, 16)) > 0.5).astype(jnp.float32)
    loss = dice_bce_loss(inputs, targets, smooth=1.0)
    jax.block_until_ready(loss)
    ref = _reference(inputs, targets, smooth=1.0)
    np.testing.assert_allclose(np.asarray(loss), np.asarray(ref), rtol=1e-5, atol=1e-5)

    # Second case exercises multi-block grid, the parallel core axis and the
    # partial-boundary-block masking path.
    inputs2 = jax.random.normal(k3, (4, 4, 128, 96), dtype=jnp.float32)
    targets2 = (jax.random.uniform(k4, (4, 4, 128, 96)) > 0.5).astype(jnp.float32)
    loss2 = dice_bce_loss(inputs2, targets2, smooth=1.0)
    jax.block_until_ready(loss2)
    ref2 = _reference(inputs2, targets2, smooth=1.0)
    np.testing.assert_allclose(np.asarray(loss2), np.asarray(ref2), rtol=1e-5, atol=1e-5)

    print("KERNEL_OK")
</pallas_src>

<mosaic_0001>
module attributes {stable_mosaic.version = 11 : i64} {
  func.func @_dice_bce_kernel(%arg0: i32, %arg1: i32, %arg2: memref<16x128xf32, #tpu.memory_space<vmem>>, %arg3: memref<16x128xf32, #tpu.memory_space<vmem>>, %arg4: memref<1x4x8x128xf32, #tpu.memory_space<vmem>>) attributes {dimension_semantics = [#tpu.dimension_semantics<parallel>, #tpu.dimension_semantics<arbitrary>], iteration_bounds = array<i64: 1, 1>, scalar_prefetch = 0 : i64, scratch_operands = 0 : i64, tpu.core_type = #tpu.core_type<tc>, window_params = [{transform_indices = @transform_0, window_bounds = array<i64: 16, 128>}, {transform_indices = @transform_1, window_bounds = array<i64: 16, 128>}, {transform_indices = @transform_2, window_bounds = array<i64: 1, 4, 8, 128>}]} {
    %c0_i32 = arith.constant 0 : i32
    %0 = arith.cmpi eq, %arg1, %c0_i32 : i32
    %1 = arith.extui %0 : i1 to i32
    %c0_i32_0 = arith.constant 0 : i32
    %2 = arith.cmpi ne, %1, %c0_i32_0 : i32
    scf.if %2 {
      %cst_46 = arith.constant 0.000000e+00 : f32
      %83 = vector.broadcast %cst_46 : f32 to vector<4x8x128xf32>
      %c0_47 = arith.constant 0 : index
      %c0_48 = arith.constant 0 : index
      %c0_49 = arith.constant 0 : index
      %c0_50 = arith.constant 0 : index
      %84 = vector.load %arg4[%c0_47, %c0_48, %c0_49, %c0_50] : memref<1x4x8x128xf32, #tpu.memory_space<vmem>>, vector<1x4x8x128xf32>
      %85 = vector.shape_cast %84 : vector<1x4x8x128xf32> to vector<4x8x128xf32>
      %86 = vector.shape_cast %83 : vector<4x8x128xf32> to vector<1x4x8x128xf32>
      tpu.vector_store %arg4[%c0_47, %c0_48, %c0_49, %c0_50], %86 {strides = array<i32>} : memref<1x4x8x128xf32, #tpu.memory_space<vmem>>, vector<1x4x8x128xf32>,
    } else {
    }
    %c0 = arith.constant 0 : index
    %c0_1 = arith.constant 0 : index
    %3 = vector.load %arg2[%c0, %c0_1] : memref<16x128xf32, #tpu.memory_space<vmem>>, vector<16x128xf32>
    %c0_2 = arith.constant 0 : index
    %c0_3 = arith.constant 0 : index
    %4 = vector.load %arg3[%c0_2, %c0_3] : memref<16x128xf32, #tpu.memory_space<vmem>>, vector<16x128xf32>
    %c1_i32 = arith.constant 1 : i32
    %5 = arith.muli %arg0, %c1_i32 : i32
    %6 = arith.addi %5, %arg1 : i32
    %c16_i32 = arith.constant 16 : i32
    %7 = arith.muli %6, %c16_i32 : i32
    %8 = tpu.iota {dimensions = array<i32: 0>} : vector<16x128xi32>
    %9 = vector.broadcast %7 : i32 to vector<16x128xi32>
    %10 = arith.addi %8, %9 : vector<16x128xi32>
    %11 = tpu.iota {dimensions = array<i32: 1>} : vector<16x128xi32>
    %c128_i32 = arith.constant 128 : i32
    %12 = vector.broadcast %c128_i32 : i32 to vector<16x128xi32>
    %13 = arith.muli %10, %12 : vector<16x128xi32>
    %14 = arith.addi %13, %11 : vector<16x128xi32>
    %c2048_i32 = arith.constant 2048 : i32
    %15 = vector.broadcast %c2048_i32 : i32 to vector<16x128xi32>
    %16 = arith.cmpi slt, %14, %15 : vector<16x128xi32>
    %17 = math.absf %3 : vector<16x128xf32>
    %cst = arith.constant 0.000000e+00 : f32
    %18 = vector.broadcast %cst : f32 to vector<16x128xf32>
    %19 = arith.subf %18, %17 : vector<16x128xf32>
    %20 = math.exp %19 : vector<16x128xf32>
    %cst_4 = arith.constant 1.000000e+00 : f32
    %21 = vector.broadcast %cst_4 : f32 to vector<16x128xf32>
    %22 = arith.addf %21, %20 : vector<16x128xf32>
    %cst_5 = arith.constant 1.000000e+00 : f32
    %23 = vector.broadcast %cst_5 : f32 to vector<16x128xf32>
    %24 = arith.divf %23, %22 : vector<16x128xf32>
    %cst_6 = arith.constant 0.000000e+00 : f32
    %25 = vector.broadcast %cst_6 : f32 to vector<16x128xf32>
    %26 = arith.cmpf oge, %3, %25 : vector<16x128xf32>
    %27 = arith.mulf %20, %24 : vector<16x128xf32>
    %28 = arith.select %26, %24, %27 : vector<16x128xi1>, vector<16x128xf32>
    %cst_7 = arith.constant 0.000000e+00 : f32
    %29 = vector.broadcast %cst_7 : f32 to vector<16x128xf32>
    %30 = arith.maximumf %3, %29 : vector<16x128xf32>
    %cst_8 = arith.constant 1.000000e+00 : f32
    %31 = vector.broadcast %cst_8 : f32 to vector<16x128xf32>
    %32 = arith.addf %31, %20 : vector<16x128xf32>
    %33 = math.log %32 : vector<16x128xf32>
    %34 = arith.addf %30, %33 : vector<16x128xf32>
    %35 = arith.subf %34, %3 : vector<16x128xf32>
    %cst_9 = arith.constant 1.000000e+02 : f32
    %36 = vector.broadcast %cst_9 : f32 to vector<16x128xf32>
    %37 = arith.minimumf %35, %36 : vector<16x128xf32>
    %38 = arith.mulf %4, %37 : vector<16x128xf32>
    %cst_10 = arith.constant 1.000000e+00 : f32
    %39 = vector.broadcast %cst_10 : f32 to vector<16x128xf32>
    %40 = arith.subf %39, %4 : vector<16x128xf32>
    %cst_11 = arith.constant 1.000000e+02 : f32
    %41 = vector.broadcast %cst_11 : f32 to vector<16x128xf32>
    %42 = arith.minimumf %34, %41 : vector<16x128xf32>
    %43 = arith.mulf %40, %42 : vector<16x128xf32>
    %44 = arith.addf %38, %43 : vector<16x128xf32>
    %cst_12 = arith.constant 0.000000e+00 : f32
    %45 = vector.broadcast %cst_12 : f32 to vector<16x128xf32>
    %c0_13 = arith.constant 0 : index
    %c0_14 = arith.constant 0 : index
    %c0_15 = arith.constant 0 : index
    %c0_16 = arith.constant 0 : index
    %46 = vector.load %arg4[%c0_13, %c0_14, %c0_15, %c0_16] : memref<1x4x8x128xf32, #tpu.memory_space<vmem>>, vector<1x1x8x128xf32>
    %47 = vector.shape_cast %46 : vector<1x1x8x128xf32> to vector<8x128xf32>
    %48 = arith.mulf %28, %4 : vector<16x128xf32>
    %49 = arith.select %16, %48, %45 : vector<16x128xi1>, vector<16x128xf32>
    %50 = vector.shape_cast %49 : vector<16x128xf32> to vector<2x8x128xf32>
    %cst_17 = arith.constant dense<0.000000e+00> : vector<8x128xf32>
    %51 = vector.multi_reduction <add>, %50, %cst_17 [0] : vector<2x8x128xf32> to vector<8x128xf32>
    %52 = arith.addf %47, %51 : vector<8x128xf32>
    %c0_18 = arith.constant 0 : index
    %c0_19 = arith.constant 0 : index
    %c0_20 = arith.constant 0 : index
    %c0_21 = arith.constant 0 : index
    %53 = vector.load %arg4[%c0_18, %c0_19, %c0_20, %c0_21] : memref<1x4x8x128xf32, #tpu.memory_space<vmem>>, vector<1x1x8x128xf32>
    %54 = vector.shape_cast %53 : vector<1x1x8x128xf32> to vector<8x128xf32>
    %55 = vector.shape_cast %52 : vector<8x128xf32> to vector<1x1x8x128xf32>
    tpu.vector_store %arg4[%c0_18, %c0_19, %c0_20, %c0_21], %55 {strides = array<i32>} : memref<1x4x8x128xf32, #tpu.memory_space<vmem>>, vector<1x1x8x128xf32>,
    %c0_22 = arith.constant 0 : index
    %c1 = arith.constant 1 : index
    %c0_23 = arith.constant 0 : index
    %c0_24 = arith.constant 0 : index
    %56 = vector.load %arg4[%c0_22, %c1, %c0_23, %c0_24] : memref<1x4x8x128xf32, #tpu.memory_space<vmem>>, vector<1x1x8x128xf32>
    %57 = vector.shape_cast %56 : vector<1x1x8x128xf32> to vector<8x128xf32>
    %58 = arith.select %16, %28, %45 : vector<16x128xi1>, vector<16x128xf32>
    %59 = vector.shape_cast %58 : vector<16x128xf32> to vector<2x8x128xf32>
    %cst_25 = arith.constant dense<0.000000e+00> : vector<8x128xf32>
    %60 = vector.multi_reduction <add>, %59, %cst_25 [0] : vector<2x8x128xf32> to vector<8x128xf32>
    %61 = arith.addf %57, %60 : vector<8x128xf32>
    %c0_26 = arith.constant 0 : index
    %c1_27 = arith.constant 1 : index
    %c0_28 = arith.constant 0 : index
    %c0_29 = arith.constant 0 : index
    %62 = vector.load %arg4[%c0_26, %c1_27, %c0_28, %c0_29] : memref<1x4x8x128xf32, #tpu.memory_space<vmem>>, vector<1x1x8x128xf32>
    %63 = vector.shape_cast %62 : vector<1x1x8x128xf32> to vector<8x128xf32>
    %64 = vector.shape_cast %61 : vector<8x128xf32> to vector<1x1x8x128xf32>
    tpu.vector_store %arg4[%c0_26, %c1_27, %c0_28, %c0_29], %64 {strides = array<i32>} : memref<1x4x8x128xf32, #tpu.memory_space<vmem>>, vector<1x1x8x128xf32>,
    %c0_30 = arith.constant 0 : index
    %c2 = arith.constant 2 : index
    %c0_31 = arith.constant 0 : index
    %c0_32 = arith.constant 0 : index
    %65 = vector.load %arg4[%c0_30, %c2, %c0_31, %c0_32] : memref<1x4x8x128xf32, #tpu.memory_space<vmem>>, vector<1x1x8x128xf32>
    %66 = vector.shape_cast %65 : vector<1x1x8x128xf32> to vector<8x128xf32>
    %67 = arith.select %16, %4, %45 : vector<16x128xi1>, vector<16x128xf32>
    %68 = vector.shape_cast %67 : vector<16x128xf32> to vector<2x8x128xf32>
    %cst_33 = arith.constant dense<0.000000e+00> : vector<8x128xf32>
    %69 = vector.multi_reduction <add>, %68, %cst_33 [0] : vector<2x8x128xf32> to vector<8x128xf32>
    %70 = arith.addf %66, %69 : vector<8x128xf32>
    %c0_34 = arith.constant 0 : index
    %c2_35 = arith.constant 2 : index
    %c0_36 = arith.constant 0 : index
    %c0_37 = arith.constant 0 : index
    %71 = vector.load %arg4[%c0_34, %c2_35, %c0_36, %c0_37] : memref<1x4x8x128xf32, #tpu.memory_space<vmem>>, vector<1x1x8x128xf32>
    %72 = vector.shape_cast %71 : vector<1x1x8x128xf32> to vector<8x128xf32>
    %73 = vector.shape_cast %70 : vector<8x128xf32> to vector<1x1x8x128xf32>
    tpu.vector_store %arg4[%c0_34, %c2_35, %c0_36, %c0_37], %73 {strides = array<i32>} : memref<1x4x8x128xf32, #tpu.memory_space<vmem>>, vector<1x1x8x128xf32>,
    %c0_38 = arith.constant 0 : index
    %c3 = arith.constant 3 : index
    %c0_39 = arith.constant 0 : index
    %c0_40 = arith.constant 0 : index
    %74 = vector.load %arg4[%c0_38, %c3, %c0_39, %c0_40] : memref<1x4x8x128xf32, #tpu.memory_space<vmem>>, vector<1x1x8x128xf32>
    %75 = vector.shape_cast %74 : vector<1x1x8x128xf32> to vector<8x128xf32>
    %76 = arith.select %16, %44, %45 : vector<16x128xi1>, vector<16x128xf32>
    %77 = vector.shape_cast %76 : vector<16x128xf32> to vector<2x8x128xf32>
    %cst_41 = arith.constant dense<0.000000e+00> : vector<8x128xf32>
    %78 = vector.multi_reduction <add>, %77, %cst_41 [0] : vector<2x8x128xf32> to vector<8x128xf32>
    %79 = arith.addf %75, %78 : vector<8x128xf32>
    %c0_42 = arith.constant 0 : index
    %c3_43 = arith.constant 3 : index
    %c0_44 = arith.constant 0 : index
    %c0_45 = arith.constant 0 : index
    %80 = vector.load %arg4[%c0_42, %c3_43, %c0_44, %c0_45] : memref<1x4x8x128xf32, #tpu.memory_space<vmem>>, vector<1x1x8x128xf32>
    %81 = vector.shape_cast %80 : vector<1x1x8x128xf32> to vector<8x128xf32>
    %82 = vector.shape_cast %79 : vector<8x128xf32> to vector<1x1x8x128xf32>
    tpu.vector_store %arg4[%c0_42, %c3_43, %c0_44, %c0_45], %82 {strides = array<i32>} : memref<1x4x8x128xf32, #tpu.memory_space<vmem>>, vector<1x1x8x128xf32>,
    return
  }
  func.func @transform_0(%arg0: i32, %arg1: i32) -> (i32, i32) {
    %c1_i32 = arith.constant 1 : i32
    %0 = arith.muli %arg0, %c1_i32 : i32
    %1 = arith.addi %0, %arg1 : i32
    %c0_i32 = arith.constant 0 : i32
    %2 = arith.minsi %1, %c0_i32 : i32
    %c0_i32_0 = arith.constant 0 : i32
    %c0_i32_1 = arith.constant 0 : i32
    return %2, %c0_i32_0 : i32, i32
  }
  func.func @transform_1(%arg0: i32, %arg1: i32) -> (i32, i32) {
    %c1_i32 = arith.constant 1 : i32
    %0 = arith.muli %arg0, %c1_i32 : i32
    %1 = arith.addi %0, %arg1 : i32
    %c0_i32 = arith.constant 0 : i32
    %2 = arith.minsi %1, %c0_i32 : i32
    %c0_i32_0 = arith.constant 0 : i32
    %c0_i32_1 = arith.constant 0 : i32
    return %2, %c0_i32_0 : i32, i32
  }
  func.func @transform_2(%arg0: i32, %arg1: i32) -> (i32, i32, i32, i32) {
    %c0_i32 = arith.constant 0 : i32
    %c0_i32_0 = arith.constant 0 : i32
    %c0_i32_1 = arith.constant 0 : i32
    %c0_i32_2 = arith.constant 0 : i32
    return %arg0, %c0_i32, %c0_i32_0, %c0_i32_1 : i32, i32, i32, i32
  }
}

</mosaic_0001>

<bundles_post_ra>
// kernel: dice_bce_loss.1
= control target key start
LH: loop header
LB: loop body
LE: loop exit
PB: predicated region body
PF: predicated region fallthrough
CT: control target
= control target key end

     0   :  { %v89_v0 = vlaneseq  ;;  %s275_s0 = inlined_call_operand.vmem [shape: f32[16,128], index: 0, kind: input, shape index: {}]   ;;  %s276_s1 = inlined_call_operand.vmem [shape: f32[16,128], index: 1, kind: input, shape index: {}]   ;;  %s277_s2 = inlined_call_operand.vmem [shape: f32[1,4,8,128], index: 2, kind: output, shape index: {}]  }
   0x1   :  { %v227_v1 = vld [vmem:[%s275_s0] sm:$0xff]  ;;  %v232_v2 = vld [vmem:[%s275_s0 + $0x8] sm:$0xff] }
   0x2   :  { %v90_v3 = vshrl.u32 %v89_v0, 7  ;;  %v96_v4 = vand.u32 127, %v89_v0  ;;  %v103_v5 = vand.u32 2147483647, %v227_v1  ;;  %v104_v6 = vand.u32 2147483647, %v232_v2 }
   0x3   :  { %v85_v15 = vld [vmem:[%s276_s1] sm:$0xff]  ;;  %v86_v18 = vld [vmem:[%s276_s1 + $0x8] sm:$0xff]  ;;  %vm117_vm2 = vcmp.ge.f32.partialorder %v227_v1, 0.0  ;;  %vm118_vm3 = vcmp.ge.f32.partialorder %v232_v2, 0.0  ;;  %v123_v28 = vmax.f32 %v227_v1, 0.0  ;;  %v124_v31 = vmax.f32 %v232_v2, 0.0 }
   0x4   :  { %v91_v7 = vadd.s32 8, %v90_v3  ;;  %v97_v8 = vmul.u32 128, %v90_v3  ;;  %v105_v9 = vsub.f32 0.0, %v103_v5  ;;  %v106_v10 = vsub.f32 0.0, %v104_v6 }
   0x5   :  { %v137_v42 = vsub.f32 1.0, %v85_v15  ;;  %v138_v46 = vsub.f32 1.0, %v86_v18 }
   0x6   :  { %v98_v11 = vmul.u32 128, %v91_v7  ;;  %v236_v12 = vadd.s32 %v97_v8, %v96_v4  ;;  %v107_v13 = vmul.f32 1.442695, %v105_v9  ;;  %v109_v14 = vmul.f32 1.442695, %v106_v10 }
   0x8   :  { %v100_v16 = vadd.s32 %v98_v11, %v96_v4  ;;  %vm101_vm0 = vcmp.lt.s32.totalorder %v236_v12, 2048  ;;  %197 = vpow2.f32 %v107_v13 }
   0x9   :  { %199 = vpow2.f32 %v109_v14  ;;  %v162_v17 = vsel %vm101_vm0, %v85_v15, 0.0 }
   0xa   :  { %vm102_vm1 = vcmp.lt.s32.totalorder %v100_v16, 2048 }
   0xb   :  { %v163_v19 = vsel %vm102_vm1, %v86_v18, 0.0 }
   0xc   :  { %v164_v20 = vadd.f32 %v163_v19, %v162_v17 }
   0xe   :  { %193 = vst [vmem:[%s277_s2 + $0x10] sm:$0xff] %v164_v20 }
  0x12   :  { %v198_v21 = vpop.eup %197 }
  0x13   :  { %v200_v22 = vpop.eup %199  ;;  %v111_v23 = vadd.f32 1.0, %v198_v21 }
  0x14   :  { %v112_v24 = vadd.f32 1.0, %v200_v22 }
  0x15   :  { %201 = vrcp.f32 %v111_v23 }
  0x16   :  { %203 = vrcp.f32 %v112_v24 }
  0x17   :  { %205 = vlog2.f32 %v111_v23 }
  0x18   :  { %207 = vlog2.f32 %v112_v24 }
  0x1f   :  { %v202_v25 = vpop.eup %201 }
  0x20   :  { %v204_v26 = vpop.eup %203  ;;  %v119_v27 = vmul.f32 %v202_v25, %v198_v21 }
  0x21   :  { %v206_v29 = vpop.eup %205  ;;  %v120_v30 = vmul.f32 %v204_v26, %v200_v22 }
  0x22   :  { %v208_v32 = vpop.eup %207  ;;  %v121_v33 = vsel %vm117_vm2, %v202_v25, %v119_v27  ;;  %v126_v34 = vmul.f32 0.6931472, %v206_v29 }
  0x23   :  { %v122_v35 = vsel %vm118_vm3, %v204_v26, %v120_v30  ;;  %v146_v36 = vmul.f32 %v121_v33, %v85_v15  ;;  %v155_v37 = vsel %vm101_vm0, %v121_v33, 0.0  ;;  %v128_v38 = vmul.f32 0.6931472, %v208_v32 }
  0x24   :  { %v147_v39 = vmul.f32 %v122_v35, %v86_v18  ;;  %v156_v40 = vsel %vm102_vm1, %v122_v35, 0.0  ;;  %v129_v41 = vadd.f32 %v126_v34, %v123_v28 }
  0x25   :  { %v148_v43 = vsel %vm101_vm0, %v146_v36, 0.0  ;;  %v157_v44 = vadd.f32 %v156_v40, %v155_v37  ;;  %v130_v45 = vadd.f32 %v128_v38, %v124_v31 }
  0x26   :  { %v149_v47 = vsel %vm102_vm1, %v147_v39, 0.0  ;;  %v131_v48 = vsub.f32 %v129_v41, %v227_v1  ;;  %v139_v49 = vmin.f32 %v129_v41, 100.0 }
  0x27   :  { %v150_v50 = vadd.f32 %v149_v47, %v148_v43  ;;  %v132_v51 = vsub.f32 %v130_v45, %v232_v2  ;;  %v140_v52 = vmin.f32 %v130_v45, 100.0  ;;  %191 = vst [vmem:[%s277_s2 + $0x8] sm:$0xff] %v157_v44 }
  0x28   :  { %v133_v53 = vmin.f32 %v131_v48, 100.0  ;;  %v141_v54 = vmul.f32 %v139_v49, %v137_v42 }
  0x29   :  { %v134_v55 = vmin.f32 %v132_v51, 100.0  ;;  %v142_v56 = vmul.f32 %v140_v52, %v138_v46  ;;  %152 = vst [vmem:[%s277_s2] sm:$0xff] %v150_v50 }
  0x2a   :  { %v135_v57 = vmul.f32 %v133_v53, %v85_v15 }
  0x2b   :  { %v136_v58 = vmul.f32 %v134_v55, %v86_v18 }
  0x2c   :  { %v143_v59 = vadd.f32 %v141_v54, %v135_v57 }
  0x2d   :  { %v144_v60 = vadd.f32 %v142_v56, %v136_v58 }
  0x2e   :  { %v169_v61 = vsel %vm101_vm0, %v143_v59, 0.0 }
  0x2f   :  { %v170_v62 = vsel %vm102_vm1, %v144_v60, 0.0 }
  0x30   :  { %v171_v63 = vadd.f32 %v170_v62, %v169_v61 }
  0x32   :  { %195 = vst [vmem:[%s277_s2 + $0x18] sm:$0xff] %v171_v63 }

</bundles_post_ra>
